<compile_context>
chip_gen: v5e
topology: v5e:2x2
jax: 0.10.0
libtpu: 0.0.40
codegen_flags: <defaults>
</compile_context>

<pallas_src>
import numpy as np

import jax
import jax.numpy as jnp
from jax.experimental import pallas as pl
from jax.experimental.pallas import tpu as pltpu


def _make_kernel(Bt, S, D, H):
    hd = D // H
    M = Bt * S

    def kernel(x_ref,
               ln1_g, ln1_b, w_in_t, b_in, w_out_t, b_out,
               ln2_g, ln2_b, w_fc_t, b_fc, w_proj_t, b_proj,
               o_ref):
        x = x_ref[...].astype(jnp.float32).reshape(M, D)       # (M, D)

        def layernorm(v, g_ref, b_ref):
            mu = jnp.mean(v, axis=-1, keepdims=True)
            var = jnp.mean((v - mu) ** 2, axis=-1, keepdims=True)
            return (v - mu) * jax.lax.rsqrt(var + 1e-5) * g_ref[...] + b_ref[...]

        # ---- self-attention branch ----
        y = layernorm(x, ln1_g, ln1_b)
        # bf16 operands, f32 accumulation.  Scale for Q already folded into w_in_t.
        qkv = jnp.dot(y.astype(jnp.bfloat16), w_in_t[...],
                      preferred_element_type=jnp.float32) + b_in[...]     # (M, 3D)
        qkv3 = qkv.astype(jnp.bfloat16).reshape(Bt, S, 3 * D)

        acc = jnp.zeros((M, D), jnp.float32)
        for h in range(H):                                     # static unroll over heads
            qh = qkv3[:, :, h * hd:(h + 1) * hd]               # (Bt, S, hd)
            kh = qkv3[:, :, D + h * hd:D + (h + 1) * hd]
            vh = qkv3[:, :, 2 * D + h * hd:2 * D + (h + 1) * hd]
            s = jnp.einsum('bqd,bkd->bqk', qh, kh,
                           preferred_element_type=jnp.float32)            # (Bt, S, S)
            s = s - jnp.max(s, axis=-1, keepdims=True)
            p = jnp.exp(s)
            p = p * pl.reciprocal(jnp.sum(p, axis=-1, keepdims=True), approx=True)
            oh = jnp.einsum('bqk,bkd->bqd', p.astype(jnp.bfloat16), vh,
                            preferred_element_type=jnp.float32)           # (Bt, S, hd)
            # accumulate this head's contribution through its slice of W_out
            acc = acc + jnp.dot(oh.reshape(M, hd).astype(jnp.bfloat16),
                                w_out_t[h * hd:(h + 1) * hd, :],
                                preferred_element_type=jnp.float32)
        x1 = x + acc + b_out[...]                              # residual 1

        # ---- MLP branch ----
        y2 = layernorm(x1, ln2_g, ln2_b)
        hdn = jnp.dot(y2.astype(jnp.bfloat16), w_fc_t[...],
                      preferred_element_type=jnp.float32) + b_fc[...]     # (M, 4D)
        hdn = hdn * jax.nn.sigmoid(1.702 * hdn)                # QuickGELU
        out = jnp.dot(hdn.astype(jnp.bfloat16), w_proj_t[...],
                      preferred_element_type=jnp.float32) + b_proj[...]
        o_ref[...] = (x1 + out).reshape(Bt, S, D).astype(o_ref.dtype)     # residual 2

    return kernel


def _pick_batch_tile(B, S, D):
    """Largest Bt dividing B whose activations fit a conservative budget,
    keeping >=2 grid steps so both v7x TensorCores get work."""
    budget = 6 << 20                      # per-step activation budget (bytes)
    best = 1
    for bt in range(1, B + 1):
        if B % bt:
            continue
        if B >= 2 and B // bt < 2:
            continue                      # keep at least 2 parallel grid steps
        act_bytes = bt * S * (14 * D) * 4  # qkv + mlp + residual intermediates, f32
        if act_bytes <= budget:
            best = bt
    return best


def residual_attention_block(x_sbd, params, num_heads):
    """x_sbd: (seq, batch, dim) float32. Returns same shape/dtype."""
    S, B, D = x_sbd.shape
    H = num_heads
    hd = D // H
    scale = 1.0 / np.sqrt(hd)
    x_bsd = jnp.transpose(x_sbd, (1, 0, 2))                    # (B, S, D)

    # One-time weight transforms (glue, not per-call activation work):
    #   - transpose Linear weights so the kernel does plain y @ W^T
    #   - fold 1/sqrt(hd) into the Q rows of the in-projection (weight + bias)
    #   - cast matmul weights to bf16 (MXU-native), keep LN params / biases f32
    q_scale = jnp.concatenate([jnp.full((D,), scale, jnp.float32),
                               jnp.ones((2 * D,), jnp.float32)])
    w_in_t = (params["w_in"] * q_scale[:, None]).T             # (D, 3D)
    b_in_s = params["b_in"] * q_scale

    wdt = jnp.bfloat16
    weights = [
        params["ln1_g"].reshape(1, D).astype(jnp.float32),
        params["ln1_b"].reshape(1, D).astype(jnp.float32),
        w_in_t.astype(wdt),
        b_in_s.reshape(1, 3 * D).astype(jnp.float32),
        params["w_out"].T.astype(wdt),
        params["b_out"].reshape(1, D).astype(jnp.float32),
        params["ln2_g"].reshape(1, D).astype(jnp.float32),
        params["ln2_b"].reshape(1, D).astype(jnp.float32),
        params["w_fc"].T.astype(wdt),
        params["b_fc"].reshape(1, 4 * D).astype(jnp.float32),
        params["w_proj"].T.astype(wdt),
        params["b_proj"].reshape(1, D).astype(jnp.float32),
    ]

    Bt = _pick_batch_tile(B, S, D)
    nb = B // Bt

    def w_spec(arr):
        # constant index_map -> single-buffered resident weight (halves weight VMEM)
        return pl.BlockSpec(arr.shape, lambda b: (0, 0),
                            pipeline_mode=pl.Buffered(buffer_count=1))

    weight_bytes = int(sum(int(np.prod(w.shape)) * w.dtype.itemsize for w in weights))
    io_bytes = 2 * B * S * D * x_sbd.dtype.itemsize
    flops = int(2 * B * S * (12 * D * D + 2 * S * D))
    transcendentals = int(B * S * (H * S + 4 * D))
    cost = pl.CostEstimate(flops=flops, transcendentals=transcendentals,
                           bytes_accessed=weight_bytes + io_bytes)

    # VMEM budget: single-buffered weights + double-buffered x/out tiles + activations.
    act_bytes = Bt * S * (14 * D) * 4
    vmem_limit = int(min(96 << 20,
                         max(32 << 20,
                             weight_bytes + 4 * Bt * S * D * 4 + 2 * act_bytes + (4 << 20))))

    kernel = _make_kernel(Bt, S, D, H)
    out_bsd = pl.pallas_call(
        kernel,
        out_shape=jax.ShapeDtypeStruct((B, S, D), x_sbd.dtype),
        grid_spec=pltpu.PrefetchScalarGridSpec(
            num_scalar_prefetch=0,
            grid=(nb,),
            in_specs=[pl.BlockSpec((Bt, S, D), lambda b: (b, 0, 0))]
                     + [w_spec(w) for w in weights],
            out_specs=pl.BlockSpec((Bt, S, D), lambda b: (b, 0, 0)),
        ),
        compiler_params=pltpu.CompilerParams(
            dimension_semantics=("parallel",),
            vmem_limit_bytes=vmem_limit),
        cost_estimate=cost,
    )(x_bsd, *weights)
    return jnp.transpose(out_bsd, (1, 0, 2))                   # back to (S, B, D)


# ---------------- pure-JAX reference (for verification) ----------------
def reference_forward(x_sbd, params, num_heads):
    S, B, D = x_sbd.shape
    H = num_heads
    hd = D // H

    def ln(v, g, b):
        mu = jnp.mean(v, -1, keepdims=True)
        var = jnp.mean((v - mu) ** 2, -1, keepdims=True)
        return (v - mu) / jnp.sqrt(var + 1e-5) * g + b

    x = x_sbd.astype(jnp.float32)
    y = ln(x, params["ln1_g"], params["ln1_b"])
    qkv = jnp.einsum("sbd,ed->sbe", y, params["w_in"]) + params["b_in"]
    q, k, v = jnp.split(qkv, 3, axis=-1)
    q = q.reshape(S, B, H, hd) / np.sqrt(hd)
    k = k.reshape(S, B, H, hd)
    v = v.reshape(S, B, H, hd)
    s = jnp.einsum("sbhd,tbhd->bhst", q, k)
    p = jax.nn.softmax(s, axis=-1)
    o = jnp.einsum("bhst,tbhd->sbhd", p, v).reshape(S, B, D)
    o = jnp.einsum("sbd,ed->sbe", o, params["w_out"]) + params["b_out"]
    x1 = x + o
    y2 = ln(x1, params["ln2_g"], params["ln2_b"])
    h1 = jnp.einsum("sbd,ed->sbe", y2, params["w_fc"]) + params["b_fc"]
    h1 = h1 * jax.nn.sigmoid(1.702 * h1)
    o2 = jnp.einsum("sbe,de->sbd", h1, params["w_proj"]) + params["b_proj"]
    return x1 + o2


if __name__ == "__main__":
    # Small shapes consistent with the module: seq=8, batch=2, feature_dim=32, heads=4.
    S, B, D, H = 8, 2, 32, 4
    key = jax.random.PRNGKey(0)
    ks = jax.random.split(key, 8)

    params = {
        "ln1_g": jnp.ones((D,), jnp.float32),
        "ln1_b": jnp.zeros((D,), jnp.float32),
        "w_in":  0.02 * jax.random.normal(ks[0], (3 * D, D), jnp.float32),
        "b_in":  0.01 * jax.random.normal(ks[1], (3 * D,), jnp.float32),
        "w_out": 0.02 * jax.random.normal(ks[2], (D, D), jnp.float32),
        "b_out": 0.01 * jax.random.normal(ks[3], (D,), jnp.float32),
        "ln2_g": jnp.ones((D,), jnp.float32),
        "ln2_b": jnp.zeros((D,), jnp.float32),
        "w_fc":  0.02 * jax.random.normal(ks[4], (4 * D, D), jnp.float32),
        "b_fc":  0.01 * jax.random.normal(ks[5], (4 * D,), jnp.float32),
        "w_proj": 0.02 * jax.random.normal(ks[6], (D, 4 * D), jnp.float32),
        "b_proj": 0.01 * jax.random.normal(ks[7], (D,), jnp.float32),
    }

    # TODO(synk): attn_mask is None in this module configuration; masked (causal)
    # attention for the CLIP text tower is not implemented in this kernel.
    x = jax.random.normal(jax.random.PRNGKey(42), (S, B, D), jnp.float32)

    out = jax.block_until_ready(residual_attention_block(x, params, H))
    ref = jax.block_until_ready(reference_forward(x, params, H))

    # bf16 matmul operands change numerics slightly vs. the f32 reference.
    np.testing.assert_allclose(np.asarray(out), np.asarray(ref), rtol=1e-2, atol=1e-2)

    print("KERNEL_OK")
</pallas_src>

<mosaic_0001>
module attributes {stable_mosaic.version = 11 : i64} {
  func.func @kernel(%arg0: i32, %arg1: memref<1x8x32xf32, #tpu.memory_space<vmem>>, %arg2: memref<1x32xf32, #tpu.memory_space<vmem>>, %arg3: memref<1x32xf32, #tpu.memory_space<vmem>>, %arg4: memref<32x96xbf16, #tpu.memory_space<vmem>>, %arg5: memref<1x96xf32, #tpu.memory_space<vmem>>, %arg6: memref<32x32xbf16, #tpu.memory_space<vmem>>, %arg7: memref<1x32xf32, #tpu.memory_space<vmem>>, %arg8: memref<1x32xf32, #tpu.memory_space<vmem>>, %arg9: memref<1x32xf32, #tpu.memory_space<vmem>>, %arg10: memref<32x128xbf16, #tpu.memory_space<vmem>>, %arg11: memref<1x128xf32, #tpu.memory_space<vmem>>, %arg12: memref<128x32xbf16, #tpu.memory_space<vmem>>, %arg13: memref<1x32xf32, #tpu.memory_space<vmem>>, %arg14: memref<1x8x32xf32, #tpu.memory_space<vmem>>) attributes {dimension_semantics = [#tpu.dimension_semantics<parallel>], iteration_bounds = array<i64: 2>, scalar_prefetch = 0 : i64, scratch_operands = 0 : i64, tpu.core_type = #tpu.core_type<tc>, window_params = [{transform_indices = @transform_0, window_bounds = array<i64: 1, 8, 32>}, {pipeline_mode = #tpu.pipeline_mode<synchronous>, transform_indices = @transform_1, window_bounds = array<i64: 1, 32>}, {pipeline_mode = #tpu.pipeline_mode<synchronous>, transform_indices = @transform_2, window_bounds = array<i64: 1, 32>}, {pipeline_mode = #tpu.pipeline_mode<synchronous>, transform_indices = @transform_3, window_bounds = array<i64: 32, 96>}, {pipeline_mode = #tpu.pipeline_mode<synchronous>, transform_indices = @transform_4, window_bounds = array<i64: 1, 96>}, {pipeline_mode = #tpu.pipeline_mode<synchronous>, transform_indices = @transform_5, window_bounds = array<i64: 32, 32>}, {pipeline_mode = #tpu.pipeline_mode<synchronous>, transform_indices = @transform_6, window_bounds = array<i64: 1, 32>}, {pipeline_mode = #tpu.pipeline_mode<synchronous>, transform_indices = @transform_7, window_bounds = array<i64: 1, 32>}, {pipeline_mode = #tpu.pipeline_mode<synchronous>, transform_indices = @transform_8, window_bounds = array<i64: 1, 32>}, {pipeline_mode = #tpu.pipeline_mode<synchronous>, transform_indices = @transform_9, window_bounds = array<i64: 32, 128>}, {pipeline_mode = #tpu.pipeline_mode<synchronous>, transform_indices = @transform_10, window_bounds = array<i64: 1, 128>}, {pipeline_mode = #tpu.pipeline_mode<synchronous>, transform_indices = @transform_11, window_bounds = array<i64: 128, 32>}, {pipeline_mode = #tpu.pipeline_mode<synchronous>, transform_indices = @transform_12, window_bounds = array<i64: 1, 32>}, {transform_indices = @transform_13, window_bounds = array<i64: 1, 8, 32>}]} {
    %c0 = arith.constant 0 : index
    %c0_0 = arith.constant 0 : index
    %c0_1 = arith.constant 0 : index
    %0 = vector.load %arg1[%c0, %c0_0, %c0_1] : memref<1x8x32xf32, #tpu.memory_space<vmem>>, vector<1x8x32xf32>
    %1 = vector.shape_cast %0 : vector<1x8x32xf32> to vector<8x32xf32>
    %cst = arith.constant dense<0.000000e+00> : vector<8xf32>
    %2 = vector.multi_reduction <add>, %1, %cst [1] : vector<8x32xf32> to vector<8xf32>
    %3 = vector.shape_cast %2 : vector<8xf32> to vector<8x1xf32>
    %cst_2 = arith.constant 3.200000e+01 : f32
    %4 = vector.broadcast %cst_2 : f32 to vector<8x1xf32>
    %5 = arith.divf %3, %4 : vector<8x1xf32>
    %6 = vector.broadcast %5 : vector<8x1xf32> to vector<8x32xf32>
    %7 = arith.subf %1, %6 : vector<8x32xf32>
    %8 = arith.mulf %7, %7 : vector<8x32xf32>
    %cst_3 = arith.constant dense<0.000000e+00> : vector<8xf32>
    %9 = vector.multi_reduction <add>, %8, %cst_3 [1] : vector<8x32xf32> to vector<8xf32>
    %10 = vector.shape_cast %9 : vector<8xf32> to vector<8x1xf32>
    %cst_4 = arith.constant 3.200000e+01 : f32
    %11 = vector.broadcast %cst_4 : f32 to vector<8x1xf32>
    %12 = arith.divf %10, %11 : vector<8x1xf32>
    %13 = vector.broadcast %5 : vector<8x1xf32> to vector<8x32xf32>
    %14 = arith.subf %1, %13 : vector<8x32xf32>
    %cst_5 = arith.constant 9.99999974E-6 : f32
    %15 = vector.broadcast %cst_5 : f32 to vector<8x1xf32>
    %16 = arith.addf %12, %15 : vector<8x1xf32>
    %17 = math.rsqrt %16 : vector<8x1xf32>
    %18 = vector.broadcast %17 : vector<8x1xf32> to vector<8x32xf32>
    %19 = arith.mulf %14, %18 : vector<8x32xf32>
    %c0_6 = arith.constant 0 : index
    %c0_7 = arith.constant 0 : index
    %20 = vector.load %arg2[%c0_6, %c0_7] : memref<1x32xf32, #tpu.memory_space<vmem>>, vector<1x32xf32>
    %21 = vector.broadcast %20 : vector<1x32xf32> to vector<8x32xf32>
    %22 = arith.mulf %19, %21 : vector<8x32xf32>
    %c0_8 = arith.constant 0 : index
    %c0_9 = arith.constant 0 : index
    %23 = vector.load %arg3[%c0_8, %c0_9] : memref<1x32xf32, #tpu.memory_space<vmem>>, vector<1x32xf32>
    %24 = vector.broadcast %23 : vector<1x32xf32> to vector<8x32xf32>
    %25 = arith.addf %22, %24 : vector<8x32xf32>
    %26 = arith.truncf %25 : vector<8x32xf32> to vector<8x32xbf16>
    %c0_10 = arith.constant 0 : index
    %c0_11 = arith.constant 0 : index
    %27 = vector.load %arg4[%c0_10, %c0_11] : memref<32x96xbf16, #tpu.memory_space<vmem>>, vector<32x96xbf16>
    %cst_12 = arith.constant dense<0.000000e+00> : vector<8x96xf32>
    %28 = tpu.matmul %26, %27, %cst_12 {dimension_numbers = #tpu.dot_dimension_numbers<[1], [0], [0], [1], [0, 0, 1, 1], [], []>} : vector<8x32xbf16>, vector<32x96xbf16>, vector<8x96xf32> -> vector<8x96xf32>
    %c0_13 = arith.constant 0 : index
    %c0_14 = arith.constant 0 : index
    %29 = vector.load %arg5[%c0_13, %c0_14] : memref<1x96xf32, #tpu.memory_space<vmem>>, vector<1x96xf32>
    %30 = vector.broadcast %29 : vector<1x96xf32> to vector<8x96xf32>
    %31 = arith.addf %28, %30 : vector<8x96xf32>
    %32 = arith.truncf %31 : vector<8x96xf32> to vector<8x96xbf16>
    %33 = vector.shape_cast %32 : vector<8x96xbf16> to vector<1x8x96xbf16>
    %cst_15 = arith.constant 0.000000e+00 : f32
    %34 = vector.broadcast %cst_15 : f32 to vector<8x32xf32>
    %35 = vector.extract_strided_slice %33 {offsets = [0, 0, 0], sizes = [1, 8, 8], strides = [1, 1, 1]} : vector<1x8x96xbf16> to vector<1x8x8xbf16>
    %36 = vector.extract_strided_slice %33 {offsets = [0, 0, 32], sizes = [1, 8, 8], strides = [1, 1, 1]} : vector<1x8x96xbf16> to vector<1x8x8xbf16>
    %37 = vector.extract_strided_slice %33 {offsets = [0, 0, 64], sizes = [1, 8, 8], strides = [1, 1, 1]} : vector<1x8x96xbf16> to vector<1x8x8xbf16>
    "tpu.trace_start"() <{level = 10 : i32, message = "bqd,bkd->bqk"}> : () -> ()
    %cst_16 = arith.constant dense<0.000000e+00> : vector<1x8x8xf32>
    %38 = tpu.matmul %35, %36, %cst_16 {dimension_numbers = #tpu.dot_dimension_numbers<[2], [2], [1], [1], [0, 0, 0, 1, 1, 1], [0], [0]>} : vector<1x8x8xbf16>, vector<1x8x8xbf16>, vector<1x8x8xf32> -> vector<1x8x8xf32>
    "tpu.trace_stop"() : () -> ()
    %cst_17 = arith.constant dense<0xFF800000> : vector<1x8xf32>
    %39 = vector.multi_reduction <maximumf>, %38, %cst_17 [2] : vector<1x8x8xf32> to vector<1x8xf32>
    %40 = vector.shape_cast %39 : vector<1x8xf32> to vector<1x8x1xf32>
    %41 = vector.broadcast %40 : vector<1x8x1xf32> to vector<1x8x8xf32>
    %42 = arith.subf %38, %41 : vector<1x8x8xf32>
    %43 = math.exp %42 : vector<1x8x8xf32>
    %cst_18 = arith.constant dense<0.000000e+00> : vector<1x8xf32>
    %44 = vector.multi_reduction <add>, %43, %cst_18 [2] : vector<1x8x8xf32> to vector<1x8xf32>
    %45 = vector.shape_cast %44 : vector<1x8xf32> to vector<1x8x1xf32>
    %46 = tpu.reciprocal %45 {approx = true} : vector<1x8x1xf32> -> vector<1x8x1xf32>
    %47 = vector.broadcast %46 : vector<1x8x1xf32> to vector<1x8x8xf32>
    %48 = arith.mulf %43, %47 : vector<1x8x8xf32>
    %49 = arith.truncf %48 : vector<1x8x8xf32> to vector<1x8x8xbf16>
    "tpu.trace_start"() <{level = 10 : i32, message = "bqk,bkd->bqd"}> : () -> ()
    %cst_19 = arith.constant dense<0.000000e+00> : vector<1x8x8xf32>
    %50 = tpu.matmul %49, %37, %cst_19 {dimension_numbers = #tpu.dot_dimension_numbers<[2], [1], [1], [2], [0, 0, 0, 1, 1, 2], [0], [0]>} : vector<1x8x8xbf16>, vector<1x8x8xbf16>, vector<1x8x8xf32> -> vector<1x8x8xf32>
    "tpu.trace_stop"() : () -> ()
    %51 = vector.shape_cast %50 : vector<1x8x8xf32> to vector<8x8xf32>
    %52 = arith.truncf %51 : vector<8x8xf32> to vector<8x8xbf16>
    %c0_20 = arith.constant 0 : index
    %c0_21 = arith.constant 0 : index
    %53 = vector.load %arg6[%c0_20, %c0_21] : memref<32x32xbf16, #tpu.memory_space<vmem>>, vector<8x32xbf16>
    %cst_22 = arith.constant dense<0.000000e+00> : vector<8x32xf32>
    %54 = tpu.matmul %52, %53, %cst_22 {dimension_numbers = #tpu.dot_dimension_numbers<[1], [0], [0], [1], [0, 0, 1, 1], [], []>} : vector<8x8xbf16>, vector<8x32xbf16>, vector<8x32xf32> -> vector<8x32xf32>
    %55 = arith.addf %34, %54 : vector<8x32xf32>
    %56 = vector.extract_strided_slice %33 {offsets = [0, 0, 8], sizes = [1, 8, 8], strides = [1, 1, 1]} : vector<1x8x96xbf16> to vector<1x8x8xbf16>
    %57 = vector.extract_strided_slice %33 {offsets = [0, 0, 40], sizes = [1, 8, 8], strides = [1, 1, 1]} : vector<1x8x96xbf16> to vector<1x8x8xbf16>
    %58 = vector.extract_strided_slice %33 {offsets = [0, 0, 72], sizes = [1, 8, 8], strides = [1, 1, 1]} : vector<1x8x96xbf16> to vector<1x8x8xbf16>
    "tpu.trace_start"() <{level = 10 : i32, message = "bqd,bkd->bqk"}> : () -> ()
    %cst_23 = arith.constant dense<0.000000e+00> : vector<1x8x8xf32>
    %59 = tpu.matmul %56, %57, %cst_23 {dimension_numbers = #tpu.dot_dimension_numbers<[2], [2], [1], [1], [0, 0, 0, 1, 1, 1], [0], [0]>} : vector<1x8x8xbf16>, vector<1x8x8xbf16>, vector<1x8x8xf32> -> vector<1x8x8xf32>
    "tpu.trace_stop"() : () -> ()
    %cst_24 = arith.constant dense<0xFF800000> : vector<1x8xf32>
    %60 = vector.multi_reduction <maximumf>, %59, %cst_24 [2] : vector<1x8x8xf32> to vector<1x8xf32>
    %61 = vector.shape_cast %60 : vector<1x8xf32> to vector<1x8x1xf32>
    %62 = vector.broadcast %61 : vector<1x8x1xf32> to vector<1x8x8xf32>
    %63 = arith.subf %59, %62 : vector<1x8x8xf32>
    %64 = math.exp %63 : vector<1x8x8xf32>
    %cst_25 = arith.constant dense<0.000000e+00> : vector<1x8xf32>
    %65 = vector.multi_reduction <add>, %64, %cst_25 [2] : vector<1x8x8xf32> to vector<1x8xf32>
    %66 = vector.shape_cast %65 : vector<1x8xf32> to vector<1x8x1xf32>
    %67 = tpu.reciprocal %66 {approx = true} : vector<1x8x1xf32> -> vector<1x8x1xf32>
    %68 = vector.broadcast %67 : vector<1x8x1xf32> to vector<1x8x8xf32>
    %69 = arith.mulf %64, %68 : vector<1x8x8xf32>
    %70 = arith.truncf %69 : vector<1x8x8xf32> to vector<1x8x8xbf16>
    "tpu.trace_start"() <{level = 10 : i32, message = "bqk,bkd->bqd"}> : () -> ()
    %cst_26 = arith.constant dense<0.000000e+00> : vector<1x8x8xf32>
    %71 = tpu.matmul %70, %58, %cst_26 {dimension_numbers = #tpu.dot_dimension_numbers<[2], [1], [1], [2], [0, 0, 0, 1, 1, 2], [0], [0]>} : vector<1x8x8xbf16>, vector<1x8x8xbf16>, vector<1x8x8xf32> -> vector<1x8x8xf32>
    "tpu.trace_stop"() : () -> ()
    %72 = vector.shape_cast %71 : vector<1x8x8xf32> to vector<8x8xf32>
    %73 = arith.truncf %72 : vector<8x8xf32> to vector<8x8xbf16>
    %c8 = arith.constant 8 : index
    %c0_27 = arith.constant 0 : index
    %74 = vector.load %arg6[%c8, %c0_27] : memref<32x32xbf16, #tpu.memory_space<vmem>>, vector<8x32xbf16>
    %cst_28 = arith.constant dense<0.000000e+00> : vector<8x32xf32>
    %75 = tpu.matmul %73, %74, %cst_28 {dimension_numbers = #tpu.dot_dimension_numbers<[1], [0], [0], [1], [0, 0, 1, 1], [], []>} : vector<8x8xbf16>, vector<8x32xbf16>, vector<8x32xf32> -> vector<8x32xf32>
    %76 = arith.addf %55, %75 : vector<8x32xf32>
    %77 = vector.extract_strided_slice %33 {offsets = [0, 0, 16], sizes = [1, 8, 8], strides = [1, 1, 1]} : vector<1x8x96xbf16> to vector<1x8x8xbf16>
    %78 = vector.extract_strided_slice %33 {offsets = [0, 0, 48], sizes = [1, 8, 8], strides = [1, 1, 1]} : vector<1x8x96xbf16> to vector<1x8x8xbf16>
    %79 = vector.extract_strided_slice %33 {offsets = [0, 0, 80], sizes = [1, 8, 8], strides = [1, 1, 1]} : vector<1x8x96xbf16> to vector<1x8x8xbf16>
    "tpu.trace_start"() <{level = 10 : i32, message = "bqd,bkd->bqk"}> : () -> ()
    %cst_29 = arith.constant dense<0.000000e+00> : vector<1x8x8xf32>
    %80 = tpu.matmul %77, %78, %cst_29 {dimension_numbers = #tpu.dot_dimension_numbers<[2], [2], [1], [1], [0, 0, 0, 1, 1, 1], [0], [0]>} : vector<1x8x8xbf16>, vector<1x8x8xbf16>, vector<1x8x8xf32> -> vector<1x8x8xf32>
    "tpu.trace_stop"() : () -> ()
    %cst_30 = arith.constant dense<0xFF800000> : vector<1x8xf32>
    %81 = vector.multi_reduction <maximumf>, %80, %cst_30 [2] : vector<1x8x8xf32> to vector<1x8xf32>
    %82 = vector.shape_cast %81 : vector<1x8xf32> to vector<1x8x1xf32>
    %83 = vector.broadcast %82 : vector<1x8x1xf32> to vector<1x8x8xf32>
    %84 = arith.subf %80, %83 : vector<1x8x8xf32>
    %85 = math.exp %84 : vector<1x8x8xf32>
    %cst_31 = arith.constant dense<0.000000e+00> : vector<1x8xf32>
    %86 = vector.multi_reduction <add>, %85, %cst_31 [2] : vector<1x8x8xf32> to vector<1x8xf32>
    %87 = vector.shape_cast %86 : vector<1x8xf32> to vector<1x8x1xf32>
    %88 = tpu.reciprocal %87 {approx = true} : vector<1x8x1xf32> -> vector<1x8x1xf32>
    %89 = vector.broadcast %88 : vector<1x8x1xf32> to vector<1x8x8xf32>
    %90 = arith.mulf %85, %89 : vector<1x8x8xf32>
    %91 = arith.truncf %90 : vector<1x8x8xf32> to vector<1x8x8xbf16>
    "tpu.trace_start"() <{level = 10 : i32, message = "bqk,bkd->bqd"}> : () -> ()
    %cst_32 = arith.constant dense<0.000000e+00> : vector<1x8x8xf32>
    %92 = tpu.matmul %91, %79, %cst_32 {dimension_numbers = #tpu.dot_dimension_numbers<[2], [1], [1], [2], [0, 0, 0, 1, 1, 2], [0], [0]>} : vector<1x8x8xbf16>, vector<1x8x8xbf16>, vector<1x8x8xf32> -> vector<1x8x8xf32>
    "tpu.trace_stop"() : () -> ()
    %93 = vector.shape_cast %92 : vector<1x8x8xf32> to vector<8x8xf32>
    %94 = arith.truncf %93 : vector<8x8xf32> to vector<8x8xbf16>
    %c16 = arith.constant 16 : index
    %c0_33 = arith.constant 0 : index
    %95 = vector.load %arg6[%c16, %c0_33] : memref<32x32xbf16, #tpu.memory_space<vmem>>, vector<8x32xbf16>
    %cst_34 = arith.constant dense<0.000000e+00> : vector<8x32xf32>
    %96 = tpu.matmul %94, %95, %cst_34 {dimension_numbers = #tpu.dot_dimension_numbers<[1], [0], [0], [1], [0, 0, 1, 1], [], []>} : vector<8x8xbf16>, vector<8x32xbf16>, vector<8x32xf32> -> vector<8x32xf32>
    %97 = arith.addf %76, %96 : vector<8x32xf32>
    %98 = vector.extract_strided_slice %33 {offsets = [0, 0, 24], sizes = [1, 8, 8], strides = [1, 1, 1]} : vector<1x8x96xbf16> to vector<1x8x8xbf16>
    %99 = vector.extract_strided_slice %33 {offsets = [0, 0, 56], sizes = [1, 8, 8], strides = [1, 1, 1]} : vector<1x8x96xbf16> to vector<1x8x8xbf16>
    %100 = vector.extract_strided_slice %33 {offsets = [0, 0, 88], sizes = [1, 8, 8], strides = [1, 1, 1]} : vector<1x8x96xbf16> to vector<1x8x8xbf16>
    "tpu.trace_start"() <{level = 10 : i32, message = "bqd,bkd->bqk"}> : () -> ()
    %cst_35 = arith.constant dense<0.000000e+00> : vector<1x8x8xf32>
    %101 = tpu.matmul %98, %99, %cst_35 {dimension_numbers = #tpu.dot_dimension_numbers<[2], [2], [1], [1], [0, 0, 0, 1, 1, 1], [0], [0]>} : vector<1x8x8xbf16>, vector<1x8x8xbf16>, vector<1x8x8xf32> -> vector<1x8x8xf32>
    "tpu.trace_stop"() : () -> ()
    %cst_36 = arith.constant dense<0xFF800000> : vector<1x8xf32>
    %102 = vector.multi_reduction <maximumf>, %101, %cst_36 [2] : vector<1x8x8xf32> to vector<1x8xf32>
    %103 = vector.shape_cast %102 : vector<1x8xf32> to vector<1x8x1xf32>
    %104 = vector.broadcast %103 : vector<1x8x1xf32> to vector<1x8x8xf32>
    %105 = arith.subf %101, %104 : vector<1x8x8xf32>
    %106 = math.exp %105 : vector<1x8x8xf32>
    %cst_37 = arith.constant dense<0.000000e+00> : vector<1x8xf32>
    %107 = vector.multi_reduction <add>, %106, %cst_37 [2] : vector<1x8x8xf32> to vector<1x8xf32>
    %108 = vector.shape_cast %107 : vector<1x8xf32> to vector<1x8x1xf32>
    %109 = tpu.reciprocal %108 {approx = true} : vector<1x8x1xf32> -> vector<1x8x1xf32>
    %110 = vector.broadcast %109 : vector<1x8x1xf32> to vector<1x8x8xf32>
    %111 = arith.mulf %106, %110 : vector<1x8x8xf32>
    %112 = arith.truncf %111 : vector<1x8x8xf32> to vector<1x8x8xbf16>
    "tpu.trace_start"() <{level = 10 : i32, message = "bqk,bkd->bqd"}> : () -> ()
    %cst_38 = arith.constant dense<0.000000e+00> : vector<1x8x8xf32>
    %113 = tpu.matmul %112, %100, %cst_38 {dimension_numbers = #tpu.dot_dimension_numbers<[2], [1], [1], [2], [0, 0, 0, 1, 1, 2], [0], [0]>} : vector<1x8x8xbf16>, vector<1x8x8xbf16>, vector<1x8x8xf32> -> vector<1x8x8xf32>
    "tpu.trace_stop"() : () -> ()
    %114 = vector.shape_cast %113 : vector<1x8x8xf32> to vector<8x8xf32>
    %115 = arith.truncf %114 : vector<8x8xf32> to vector<8x8xbf16>
    %c24 = arith.constant 24 : index
    %c0_39 = arith.constant 0 : index
    %116 = vector.load %arg6[%c24, %c0_39] : memref<32x32xbf16, #tpu.memory_space<vmem>>, vector<8x32xbf16>
    %cst_40 = arith.constant dense<0.000000e+00> : vector<8x32xf32>
    %117 = tpu.matmul %115, %116, %cst_40 {dimension_numbers = #tpu.dot_dimension_numbers<[1], [0], [0], [1], [0, 0, 1, 1], [], []>} : vector<8x8xbf16>, vector<8x32xbf16>, vector<8x32xf32> -> vector<8x32xf32>
    %118 = arith.addf %97, %117 : vector<8x32xf32>
    %119 = arith.addf %1, %118 : vector<8x32xf32>
    %c0_41 = arith.constant 0 : index
    %c0_42 = arith.constant 0 : index
    %120 = vector.load %arg7[%c0_41, %c0_42] : memref<1x32xf32, #tpu.memory_space<vmem>>, vector<1x32xf32>
    %121 = vector.broadcast %120 : vector<1x32xf32> to vector<8x32xf32>
    %122 = arith.addf %119, %121 : vector<8x32xf32>
    %cst_43 = arith.constant dense<0.000000e+00> : vector<8xf32>
    %123 = vector.multi_reduction <add>, %122, %cst_43 [1] : vector<8x32xf32> to vector<8xf32>
    %124 = vector.shape_cast %123 : vector<8xf32> to vector<8x1xf32>
    %cst_44 = arith.constant 3.200000e+01 : f32
    %125 = vector.broadcast %cst_44 : f32 to vector<8x1xf32>
    %126 = arith.divf %124, %125 : vector<8x1xf32>
    %127 = vector.broadcast %126 : vector<8x1xf32> to vector<8x32xf32>
    %128 = arith.subf %122, %127 : vector<8x32xf32>
    %129 = arith.mulf %128, %128 : vector<8x32xf32>
    %cst_45 = arith.constant dense<0.000000e+00> : vector<8xf32>
    %130 = vector.multi_reduction <add>, %129, %cst_45 [1] : vector<8x32xf32> to vector<8xf32>
    %131 = vector.shape_cast %130 : vector<8xf32> to vector<8x1xf32>
    %cst_46 = arith.constant 3.200000e+01 : f32
    %132 = vector.broadcast %cst_46 : f32 to vector<8x1xf32>
    %133 = arith.divf %131, %132 : vector<8x1xf32>
    %134 = vector.broadcast %126 : vector<8x1xf32> to vector<8x32xf32>
    %135 = arith.subf %122, %134 : vector<8x32xf32>
    %cst_47 = arith.constant 9.99999974E-6 : f32
    %136 = vector.broadcast %cst_47 : f32 to vector<8x1xf32>
    %137 = arith.addf %133, %136 : vector<8x1xf32>
    %138 = math.rsqrt %137 : vector<8x1xf32>
    %139 = vector.broadcast %138 : vector<8x1xf32> to vector<8x32xf32>
    %140 = arith.mulf %135, %139 : vector<8x32xf32>
    %c0_48 = arith.constant 0 : index
    %c0_49 = arith.constant 0 : index
    %141 = vector.load %arg8[%c0_48, %c0_49] : memref<1x32xf32, #tpu.memory_space<vmem>>, vector<1x32xf32>
    %142 = vector.broadcast %141 : vector<1x32xf32> to vector<8x32xf32>
    %143 = arith.mulf %140, %142 : vector<8x32xf32>
    %c0_50 = arith.constant 0 : index
    %c0_51 = arith.constant 0 : index
    %144 = vector.load %arg9[%c0_50, %c0_51] : memref<1x32xf32, #tpu.memory_space<vmem>>, vector<1x32xf32>
    %145 = vector.broadcast %144 : vector<1x32xf32> to vector<8x32xf32>
    %146 = arith.addf %143, %145 : vector<8x32xf32>
    %147 = arith.truncf %146 : vector<8x32xf32> to vector<8x32xbf16>
    %c0_52 = arith.constant 0 : index
    %c0_53 = arith.constant 0 : index
    %148 = vector.load %arg10[%c0_52, %c0_53] : memref<32x128xbf16, #tpu.memory_space<vmem>>, vector<32x128xbf16>
    %cst_54 = arith.constant dense<0.000000e+00> : vector<8x128xf32>
    %149 = tpu.matmul %147, %148, %cst_54 {dimension_numbers = #tpu.dot_dimension_numbers<[1], [0], [0], [1], [0, 0, 1, 1], [], []>} : vector<8x32xbf16>, vector<32x128xbf16>, vector<8x128xf32> -> vector<8x128xf32>
    %c0_55 = arith.constant 0 : index
    %c0_56 = arith.constant 0 : index
    %150 = vector.load %arg11[%c0_55, %c0_56] : memref<1x128xf32, #tpu.memory_space<vmem>>, vector<1x128xf32>
    %151 = vector.broadcast %150 : vector<1x128xf32> to vector<8x128xf32>
    %152 = arith.addf %149, %151 : vector<8x128xf32>
    %cst_57 = arith.constant 1.702000e+00 : f32
    %153 = vector.broadcast %cst_57 : f32 to vector<8x128xf32>
    %154 = arith.mulf %153, %152 : vector<8x128xf32>
    %155 = arith.negf %154 : vector<8x128xf32>
    %156 = math.exp %155 : vector<8x128xf32>
    %cst_58 = arith.constant 1.000000e+00 : f32
    %157 = vector.broadcast %cst_58 : f32 to vector<8x128xf32>
    %158 = arith.addf %157, %156 : vector<8x128xf32>
    %159 = arith.divf %157, %158 : vector<8x128xf32>
    %160 = arith.mulf %152, %159 : vector<8x128xf32>
    %161 = arith.truncf %160 : vector<8x128xf32> to vector<8x128xbf16>
    %c0_59 = arith.constant 0 : index
    %c0_60 = arith.constant 0 : index
    %162 = vector.load %arg12[%c0_59, %c0_60] : memref<128x32xbf16, #tpu.memory_space<vmem>>, vector<128x32xbf16>
    %cst_61 = arith.constant dense<0.000000e+00> : vector<8x32xf32>
    %163 = tpu.matmul %161, %162, %cst_61 {dimension_numbers = #tpu.dot_dimension_numbers<[1], [0], [0], [1], [0, 0, 1, 1], [], []>} : vector<8x128xbf16>, vector<128x32xbf16>, vector<8x32xf32> -> vector<8x32xf32>
    %c0_62 = arith.constant 0 : index
    %c0_63 = arith.constant 0 : index
    %164 = vector.load %arg13[%c0_62, %c0_63] : memref<1x32xf32, #tpu.memory_space<vmem>>, vector<1x32xf32>
    %165 = vector.broadcast %164 : vector<1x32xf32> to vector<8x32xf32>
    %166 = arith.addf %163, %165 : vector<8x32xf32>
    %167 = arith.addf %122, %166 : vector<8x32xf32>
    %168 = vector.shape_cast %167 : vector<8x32xf32> to vector<1x8x32xf32>
    %c0_64 = arith.constant 0 : index
    %c0_65 = arith.constant 0 : index
    %c0_66 = arith.constant 0 : index
    %169 = vector.load %arg14[%c0_64, %c0_65, %c0_66] : memref<1x8x32xf32, #tpu.memory_space<vmem>>, vector<1x8x32xf32>
    tpu.vector_store %arg14[%c0_64, %c0_65, %c0_66], %168 {strides = array<i32>} : memref<1x8x32xf32, #tpu.memory_space<vmem>>, vector<1x8x32xf32>,
    return
  }
  func.func @transform_0(%arg0: i32) -> (i32, i32, i32) {
    %c0_i32 = arith.constant 0 : i32
    %c0_i32_0 = arith.constant 0 : i32
    %c0_i32_1 = arith.constant 0 : i32
    return %arg0, %c0_i32, %c0_i32_0 : i32, i32, i32
  }
  func.func @transform_1(%arg0: i32) -> (i32, i32) {
    %c0_i32 = arith.constant 0 : i32
    %c0_i32_0 = arith.constant 0 : i32
    %c0_i32_1 = arith.constant 0 : i32
    return %c0_i32, %c0_i32_0 : i32, i32
  }
  func.func @transform_2(%arg0: i32) -> (i32, i32) {
    %c0_i32 = arith.constant 0 : i32
    %c0_i32_0 = arith.constant 0 : i32
    %c0_i32_1 = arith.constant 0 : i32
    return %c0_i32, %c0_i32_0 : i32, i32
  }
  func.func @transform_3(%arg0: i32) -> (i32, i32) {
    %c0_i32 = arith.constant 0 : i32
    %c0_i32_0 = arith.constant 0 : i32
    %c0_i32_1 = arith.constant 0 : i32
    return %c0_i32, %c0_i32_0 : i32, i32
  }
  func.func @transform_4(%arg0: i32) -> (i32, i32) {
    %c0_i32 = arith.constant 0 : i32
    %c0_i32_0 = arith.constant 0 : i32
    %c0_i32_1 = arith.constant 0 : i32
    return %c0_i32, %c0_i32_0 : i32, i32
  }
  func.func @transform_5(%arg0: i32) -> (i32, i32) {
    %c0_i32 = arith.constant 0 : i32
    %c0_i32_0 = arith.constant 0 : i32
    %c0_i32_1 = arith.constant 0 : i32
    return %c0_i32, %c0_i32_0 : i32, i32
  }
  func.func @transform_6(%arg0: i32) -> (i32, i32) {
    %c0_i32 = arith.constant 0 : i32
    %c0_i32_0 = arith.constant 0 : i32
    %c0_i32_1 = arith.constant 0 : i32
    return %c0_i32, %c0_i32_0 : i32, i32
  }
  func.func @transform_7(%arg0: i32) -> (i32, i32) {
    %c0_i32 = arith.constant 0 : i32
    %c0_i32_0 = arith.constant 0 : i32
    %c0_i32_1 = arith.constant 0 : i32
    return %c0_i32, %c0_i32_0 : i32, i32
  }
  func.func @transform_8(%arg0: i32) -> (i32, i32) {
    %c0_i32 = arith.constant 0 : i32
    %c0_i32_0 = arith.constant 0 : i32
    %c0_i32_1 = arith.constant 0 : i32
    return %c0_i32, %c0_i32_0 : i32, i32
  }
  func.func @transform_9(%arg0: i32) -> (i32, i32) {
    %c0_i32 = arith.constant 0 : i32
    %c0_i32_0 = arith.constant 0 : i32
    %c0_i32_1 = arith.constant 0 : i32
    return %c0_i32, %c0_i32_0 : i32, i32
  }
  func.func @transform_10(%arg0: i32) -> (i32, i32) {
    %c0_i32 = arith.constant 0 : i32
    %c0_i32_0 = arith.constant 0 : i32
    %c0_i32_1 = arith.constant 0 : i32
    return %c0_i32, %c0_i32_0 : i32, i32
  }
  func.func @transform_11(%arg0: i32) -> (i32, i32) {
    %c0_i32 = arith.constant 0 : i32
    %c0_i32_0 = arith.constant 0 : i32
    %c0_i32_1 = arith.constant 0 : i32
    return %c0_i32, %c0_i32_0 : i32, i32
  }
  func.func @transform_12(%arg0: i32) -> (i32, i32) {
    %c0_i32 = arith.constant 0 : i32
    %c0_i32_0 = arith.constant 0 : i32
    %c0_i32_1 = arith.constant 0 : i32
    return %c0_i32, %c0_i32_0 : i32, i32
  }
  func.func @transform_13(%arg0: i32) -> (i32, i32, i32) {
    %c0_i32 = arith.constant 0 : i32
    %c0_i32_0 = arith.constant 0 : i32
    %c0_i32_1 = arith.constant 0 : i32
    return %arg0, %c0_i32, %c0_i32_0 : i32, i32, i32
  }
}

</mosaic_0001>

<bundles_post_ra>
// kernel: tpu_custom_call.1
= control target key start
LH: loop header
LB: loop body
LE: loop exit
PB: predicated region body
PF: predicated region fallthrough
CT: control target
= control target key end

     0   :  { %s1628_s0 = inlined_call_operand.vmem [shape: f32[2,8,32], index: 0, kind: input, shape index: {}]   ;;  %s1629_s1 = inlined_call_operand.vmem [shape: f32[1,32], index: 1, kind: input, shape index: {}]   ;;  %s1630_s2 = inlined_call_operand.vmem [shape: f32[1,32], index: 2, kind: input, shape index: {}]   ;;  %s1631_s3 = inlined_call_operand.vmem [shape: bf16[32,96], index: 3, kind: input, shape index: {}]   ;;  %s1632_s4 = inlined_call_operand.vmem [shape: f32[1,96], index: 4, kind: input, shape index: {}]   ;;  %s1633_s5 = inlined_call_operand.vmem [shape: bf16[32,32], index: 5, kind: input, shape index: {}]   ;;  %s1634_s6 = inlined_call_operand.vmem [shape: f32[1,32], index: 6, kind: input, shape index: {}]   ;;  %s1635_s7 = inlined_call_operand.vmem [shape: f32[1,32], index: 7, kind: input, shape index: {}]   ;;  %s1636_s8 = inlined_call_operand.vmem [shape: f32[1,32], index: 8, kind: input, shape index: {}]   ;;  %s1637_s9 = inlined_call_operand.vmem [shape: bf16[32,128], index: 9, kind: input, shape index: {}]   ;;  %s1638_s10 = inlined_call_operand.vmem [shape: f32[1,128], index: 10, kind: input, shape index: {}]   ;;  %s1639_s11 = inlined_call_operand.vmem [shape: bf16[128,32], index: 11, kind: input, shape index: {}]   ;;  %s1640_s12 = inlined_call_operand.vmem [shape: f32[1,32], index: 12, kind: input, shape index: {}]   ;;  %s1641_s13 = inlined_call_operand.hbm [shape: f32[2,8,32], index: 13, kind: output, shape index: {}]  }
   0x1   :  { %1642 = sst [smem:[#allocation5_spill]] %s1628_s0 }
   0x2   :  { %1643 = sst [smem:[#allocation6_spill]] %s1629_s1 }
   0x3   :  { %1644 = sst [smem:[#allocation7_spill]] %s1630_s2 }
   0x4   :  { %1645 = sst [smem:[#allocation8_spill]] %s1631_s3 }
   0x5   :  { %18 = vsyncpa [#allocation3], 0 }
   0x6   :  { %20 = vsyncpa [#allocation3 + $0x1], 0  ;;  %s1400_s25 = smov 0   ;;  %s1402_s26 = smov 0  }
   0x7   :  { %s1404_s27 = smov 0   ;;  %s1406_s28 = smov 0  }
   0x8 LB: > { %s1421_s29 = sadd.s32 4294967295, %s1316_s28   ;;  %s1084_s30 = sadd.s32 4294967294, %s1316_s28   ;;  %s1316_s28 = sphi %s1406_s28, %s1655_s28   ;;  %s1312_s27 = sphi %s1404_s27, %s1654_s27   ;;  %s1308_s26 = sphi %s1402_s26, %s1653_s26   ;;  %s1304_s25 = sphi %s1400_s25, %s1652_s25  }
   0x9   : > { %s1425_s14 = sadd.s32 1, %s1316_s28   ;;  %s311_s15 = sadd.s32 1, %s1312_s27 }
   0xa   : > { %s308_s16 = ssub.s32 %s1316_s28, %s1425_s14  ;;  %p321_p0 = scmp.ne.s32.totalorder %s1312_s27, %s1308_s26 }
   0xb   : > { %p309_p1 = scmp.eq.s32.totalorder %s308_s16, 0  ;;  %p322_p2 = scmp.eq.s32.totalorder %s1421_s29, 1 }
   0xc   : > { %p327_p3 = scmp.ne.s32.totalorder %s1308_s26, %s1304_s25  ;;  %p328_p4 = scmp.eq.s32.totalorder %s1084_s30, 1 }
   0xd   : > { %s1436_s17 = scalar_select %p309_p1, %s1312_s27, %s311_s15  }
   0xe   : > { %p1438_p5 = por %p322_p2, %p321_p0  ;;  %p1442_p6 = por %p328_p4, %p327_p3 }
   0xf   : > { %p1087_p7 = scmp.ge.s32.totalorder %s1316_s28, 1  ;;  %p389_p8 = scmp.lt.s32.totalorder %s1316_s28, 3 }
  0x11   : > { %p390_p9 = pnand %p1087_p7, %p389_p8 }
  0x12   : > { %p432_p10 = scmp.lt.s32.totalorder (!%p390_p9), %s1421_s29, 1  ;;  %s1648_s0 = sld [smem:[#allocation5_spill]] (!%p390_p9) }
  0x13   : > { %393 = sbr.rel (%p390_p9) target bundleno = 2315 (0x90b), region = 72  ;;  %s1649_s3 = sld [smem:[#allocation8_spill]] (!%p390_p9) }
  0x14   : > { %s1650_s1 = sld [smem:[#allocation6_spill]] (!%p390_p9)  ;;  %s1319_s16 = smov (!%p390_p9), 88  }
  0x15   : > { %s1651_s2 = sld [smem:[#allocation7_spill]] (!%p390_p9)  ;;  %s1322_s22 = smov (!%p390_p9), 112  }
  0x16   : > { %s1323_s23 = smov (!%p390_p9), 64   ;;  %s1325_s30 = smov (!%p390_p9), 72  }
  0x17   : > { %s1326_s15 = smov (!%p390_p9), 104  }
  0x18   : > { %s433_s20 = scalar_select %p432_p10, %s1421_s29, 1  ;;  %vm438_vm0 = vcmask 261120   ;;  %v1318_v2 = vmov 32.0   ;;  %v1222_v32 = vld [vmem:[%s1632_s4] ss:$0 sm:$0xff]  ;;  %vm521_vm5 = vcmask 64512  }
  0x19   : > { %1228 = vrcp.f32 %v1318_v2  ;;  %v1158_v14 = vld [vmem:[%s1649_s3 + $0x8] sm:$0xff]  ;;  %v1157_v15 = vld [vmem:[%s1649_s3] sm:$0xff]  ;;  %vm558_vm6 = vcmask 1043456  }
  0x1a   : > { %s1089_s21 = sshll.u32 %s433_s20, 3  ;;  %508 = vmatpush.bf16.msra.mxu0 %v1158_v14  ;;  %v1220_v25 = vld [vmem:[%s1650_s1] ss:$0 sm:$0xff]  ;;  %s1320_s20 = smov 96  }
  0x1b   : > { %s435_s24 = scalar_lea.vmem %s1648_s0, %s1089_s21  ;;  %v1221_v28 = vld [vmem:[%s1651_s2] ss:$0 sm:$0xff]  ;;  %s1321_s21 = smov 80  }
  0x1c   : > { %v1453_v0 = vld [vmem:[%s435_s24] sm:$0xff]  ;;  %s1324_s24 = smov 120   ;;  %s429_s0 = sand.u32 1, %s1308_s26  }
  0x1d   : > { %v439_v1 = vsel %vm438_vm0, %v1453_v0, 0.0  ;;  %v576_v53 = vld [vmem:[%s1633_s5] sm:$0xf]  ;;  %s1088_s1 = sshll.u32 %s429_s0, 3 }
  0x1e   : > { %440 = vadd.xlane.f32.xlu0 %v439_v1  ;;  %509 = vmatpush.bf16.msra.mxu0 %v1157_v15  ;;  %v658_v54 = vsel %vm558_vm6, %v576_v53, 0 }
  0x1f   : > { %v1229_v3 = vpop.eup %1228  ;;  %667 = vmatpush.bf16.msra.mxu1 %v658_v54 }
  0x20   : > { %v443_v4 = vmul.f32 32.0, %v1229_v3  ;;  %vm447_vm1 = vweird.f32 %v1229_v3 }
  0x22   : > { %v444_v5 = vsub.f32 1.0, %v443_v4 }
  0x24   : > { %v445_v6 = vmul.f32 %v1229_v3, %v444_v5 }
  0x26   : > { %v446_v7 = vadd.f32 %v1229_v3, %v445_v6 }
  0x28   : > { %v1457_v8 = vsel %vm447_vm1, %v1229_v3, %v446_v7 }
  0x91   : > { %v441_v9 = vpop.xlane.xlu0 %440 }
  0x92   : > { %v449_v10 = vmul.f32 %v1457_v8, %v441_v9 }
  0x94   : > { %v450_v11 = vsub.f32 %v1453_v0, %v449_v10 }
  0x96   : > { %v451_v12 = vmul.f32 %v450_v11, %v450_v11 }
  0x98   : > { %v452_v13 = vsel %vm438_vm0, %v451_v12, 0.0 }
  0x99   : > { %453 = vadd.xlane.f32.xlu0 %v452_v13 }
 0x10c   : > { %v454_v16 = vpop.xlane.xlu0 %453 }
 0x10d   : > { %v455_v17 = vmul.f32 %v454_v16, %v1457_v8 }
 0x10f   : > { %v456_v18 = vadd.f32 1e-05, %v455_v17 }
 0x111   : > { %1230 = vrsqrt.f32 %v456_v18  ;;  %vm463_vm3 = vweird.f32 %v456_v18 }
 0x117   : > { %v1231_v19 = vpop.eup %1230 }
 0x118   : > { %v458_v20 = vmul.f32 %v1231_v19, %v456_v18  ;;  %vm464_vm2 = vweird.f32 %v1231_v19 }
 0x119   : > { %vm465_vm4 = vmor %vm463_vm3, %vm464_vm2 }
 0x11a   : > { %v459_v21 = vmul.f32 %v1231_v19, %v458_v20 }
 0x11c   : > { %v460_v22 = vmul.f32 0.5, %v459_v21 }
 0x11e   : > { %v461_v23 = vsub.f32 1.5, %v460_v22 }
 0x120   : > { %v462_v24 = vmul.f32 %v1231_v19, %v461_v23 }
 0x122   : > { %v466_v26 = vsel %vm465_vm4, %v1231_v19, %v462_v24 }
 0x123   : > { %v467_v27 = vmul.f32 %v466_v26, %v450_v11 }
 0x125   : > { %v472_v29 = vmul.f32 %v1220_v25, %v467_v27 }
 0x127   : > { %v477_v30 = vadd.f32 %v1221_v28, %v472_v29 }
 0x129   : > { %v478_v31 = vpack.c.bf16 %v477_v30, %v477_v30 }
 0x12b   : > { %1098 = vmatmul.msk.bf16.vlgmr.msra.gmra.mxu0 %vm438_vm0, %v478_v31 }
 0x1a8   : > { %v511_v33 = vpop.f32.mrf.mxu0 }
 0x1a9   : > { %v512_v34 = vadd.f32 %v1222_v32, %v511_v33 }
 0x1ab   : > { %v515_v35 = vpack.c.bf16 %v512_v34, %v512_v34 }
 0x1ad   : > { %v517_v36 = vunpack.c.l.b16 %v515_v35 }
 0x1af   : > { %v1479_v37 = vpack.c.b16 %v517_v36, %v517_v36 }
 0x1b0   : > { %v513_v38 = vpop.f32.mrf.mxu0 }
 0x1b1   : > { %579 = vrot.lane.b32.xlu0 %v1479_v37, %s1319_s16  ;;  %519 = vrot.lane.b32.xlu1 %v1479_v37, %s1320_s20 }
 0x1b9   : > { %675 = vrot.lane.b32.xlu0 %v1479_v37, %s1321_s21  ;;  %s1327_s21 = smov 40  }
 0x1c1   : > { %673 = vrot.lane.b32.xlu0 %v1479_v37, %s1322_s22  ;;  %s1328_s22 = smov 56  }
 0x223   : > { %v580_v39 = vpop.permute.xlu0 %579  ;;  %v520_v40 = vpop.permute.xlu1 %519 }
 0x224   : > { %v526_v41 = vsel %vm521_vm5, %v520_v40, 0  ;;  %v585_v42 = vsel %vm521_vm5, %v580_v39, 0 }
 0x225   : > { %535 = vmatpush.bf16.xpose.msra.mxu3 %v526_v41 }
 0x22b   : > { %v676_v43 = vpop.permute.xlu0 %675 }
 0x22c   : > { %v681_v44 = vsel %vm521_vm5, %v676_v43, 0  ;;  %1099 = vmatmul.msk.bf16.vlgmr.msra.gmra.mxu3 %vm521_vm5, %v515_v35 }
 0x22d   : > { %594 = vmatpush.bf16.xpose.msrb.mxu3 %v585_v42 }
 0x233   : > { %v674_v1 = vpop.permute.xlu0 %673 }
 0x235   : > { %690 = vmatpush.bf16.xpose.msra.mxu3 %v681_v44 }
 0x2af   : > { %v537_v45 = vpop.f32.mrf.mxu3 }
 0x2b0   : > { %v541_v46 = vsel %vm521_vm5, %v537_v45, -inf }
 0x2b1   : > { %542 = vmax.xlane.f32.xlu1 %v541_v46 }
 0x2b7   : > { %v539_v47 = vpop.f32.mrf.mxu3 }
 0x2b8   : > { %v634_v47 = vld [vmem:[%s1633_s5 + $0x4] sm:$0xf] }
 0x324   : > { %v543_v48 = vpop.xlane.xlu1 %542 }
 0x325   : > { %v544_v49 = vsub.f32 %v537_v45, %v543_v48  ;;  %v639_v48 = vsel %vm558_vm6, %v634_v47, 0  ;;  %v1161_v47 = vld [vmem:[%s1639_s11] sm:$0xff] }
 0x326   : > { %648 = vmatpush.bf16.msrb.mxu0 %v639_v48 }
 0x327   : > { %v545_v50 = vmul.f32 1.442695, %v544_v49 }
 0x329   : > { %1232 = vpow2.f32 %v545_v50  ;;  %v730_v50 = vld [vmem:[%s1633_s5 + $0x8] sm:$0xf] }
 0x32f   : > { %v1233_v51 = vpop.eup %1232 }
 0x330   : > { %v547_v52 = vsel %vm521_vm5, %v1233_v51, 0.0 }
 0x331   : > { %548 = vadd.xlane.f32.xlu2 %v547_v52 }
 0x349   : > { %553 = vrot.lane.b32.xlu2 %v1479_v37, %s1323_s23  ;;  %s1329_s23 = smov 48  }
 0x351   : > { %577 = vrot.lane.b32.xlu2 %v1479_v37, %s1324_s24  ;;  %s1154_s24 = sshll.u32 %s1421_s29, 3  ;;  %s1010_s29 = scalar_lea.sflag [#allocation3], %s429_s0 }
 0x359   : > { %753 = vrot.lane.b32.xlu2 %v1479_v37, %s1325_s30 }
 0x361   : > { %751 = vrot.lane.b32.xlu2 %v1479_v37, %s1326_s15 }
 0x3a4   : > { %v549_v55 = vpop.xlane.xlu2 %548 }
 0x3a5   : > { %1234 = vrcp.f32 %v549_v55  ;;  %v808_v55 = vld [vmem:[%s1633_s5 + $0xc] sm:$0xf] }
 0x3ab   : > { %v1235_v56 = vpop.eup %1234 }
 0x3ac   : > { %v554_v57 = vpop.permute.xlu2 %553  ;;  %v551_v58 = vmul.f32 %v1235_v56, %v1233_v51  ;;  %v735_v51 = vsel %vm558_vm6, %v730_v50, 0  ;;  %v813_v56 = vsel %vm558_vm6, %v808_v55, 0 }
 0x3ad   : > { %v560_v59 = vsel %vm558_vm6, %v554_v57, 0  ;;  %744 = vmatpush.bf16.msra.mxu0 %v735_v51 }
 0x3ae   : > { %569 = vmatpush.bf16.msra.mxu2 %v560_v59  ;;  %v552_v60 = vpack.c.bf16 %v551_v58, %v551_v58 }
 0x3b1   : > { %1100 = vmatmul.msk.bf16.vlgmr.msra.gmra.mxu2 %vm521_vm5, %v552_v60 }
 0x3b4   : > { %v578_v61 = vpop.permute.xlu2 %577 }
 0x3b5   : > { %1101 = vmatmul.msk.bf16.vlgmr.msrb.gmra.mxu3 %vm521_vm5, %v578_v61 }
 0x3bc   : > { %v754_v62 = vpop.permute.xlu2 %753 }
 0x3bd   : > { %v759_v63 = vsel %vm521_vm5, %v754_v62, 0 }
 0x3be   : > { %768 = vmatpush.bf16.xpose.msrb.mxu1 %v759_v63 }
 0x3c4   : > { %v752_v9 = vpop.permute.xlu2 %751 }
 0x3c5   : > { %1105 = vmatmul.msk.bf16.vlgmr.msra.gmra.mxu3 %vm521_vm5, %v674_v1 }
 0x434   : > { %v571_v2 = vpop.f32.mrf.mxu2 }
 0x435   : > { %v575_v3 = vpack.c.bf16 %v571_v2, %v571_v2 }
 0x437   : > { %1104 = vmatmul.msk.bf16.vlgmr.msra.gmra.mxu1 %vm521_vm5, %v575_v3 }
 0x438   : > { %v596_v4 = vpop.f32.mrf.mxu3 }
 0x439   : > { %v600_v5 = vsel %vm521_vm5, %v596_v4, -inf }
 0x43a   : > { %601 = vmax.xlane.f32.xlu1 %v600_v5 }
 0x43c   : > { %v573_v6 = vpop.f32.mrf.mxu2 }
 0x440   : > { %v598_v7 = vpop.f32.mrf.mxu3 }
 0x447   : > { %1108 = vmatmul.msk.bf16.vlgmr.msrb.gmra.mxu1 %vm521_vm5, %v752_v9 }
 0x448   : > { %v692_v10 = vpop.f32.mrf.mxu3 }
 0x449   : > { %v696_v11 = vsel %vm521_vm5, %v692_v10, -inf }
 0x44a   : > { %697 = vmax.xlane.f32.xlu2 %v696_v11 }
 0x450   : > { %v694_v12 = vpop.f32.mrf.mxu3 }
 0x451   : > { %v1223_v12 = vld [vmem:[%s1634_s6] ss:$0 sm:$0xff] }
 0x462   : > { %786 = vrot.lane.b32.xlu2 %v1479_v37, %s1327_s21  ;;  %s1020_s21 = scalar_lea.hbm %s1641_s13, %s1154_s24 }
 0x463   : > { %s1024_s2 = sshll.u32 %s1020_s21, 4  ;;  %s1025_s2 = int_to_ptr.hbm [resolvable:$true] %s1024_s2 }
 0x464   : > { %s1268_s3 = sshra.s32 %s1025_s2, 4  ;;  %s1269_s3 = int_to_ptr.hbm [resolvable:$true] %s1268_s3 }
 0x465   : > { %s1270_s30 = scalar_lea.hbm %s1269_s3, 8  ;;  %p1275_p0 = scmp.lt.s32.totalorder %s1269_s3, %s1641_s13 }
 0x466   : > { %p1271_p11 = scmp.ne.s32.totalorder %s1269_s3, %s1270_s30 }
 0x468   : > { %p1272_p12 = pnand %p1271_p11, %p1438_p5 }
 0x46a   : > { %p1273_p13 = pneg %p1272_p12 }
 0x4ad   : > { %v602_v13 = vpop.xlane.xlu1 %601 }
 0x4ae   : > { %v603_v14 = vsub.f32 %v596_v4, %v602_v13 }
 0x4b0   : > { %v604_v15 = vmul.f32 1.442695, %v603_v14 }
 0x4b2   : > { %1236 = vpow2.f32 %v604_v15 }
 0x4b4   : > { %v1509_v16 = vpop.f32.mrf.mxu1 }
 0x4b8   : > { %v1237_v17 = vpop.eup %1236 }
 0x4b9   : > { %v606_v18 = vsel %vm521_vm5, %v1237_v17, 0.0 }
 0x4ba   : > { %607 = vadd.xlane.f32.xlu1 %v606_v18 }
 0x4bc   : > { %v671_v19 = vpop.f32.mrf.mxu1 }
 0x4bd   : > { %v698_v20 = vpop.xlane.xlu2 %697 }
 0x4be   : > { %v699_v21 = vsub.f32 %v692_v10, %v698_v20 }
 0x4c0   : > { %v700_v22 = vmul.f32 1.442695, %v699_v21 }
 0x4c2   : > { %1238 = vpow2.f32 %v700_v22  ;;  %v1159_v22 = vld [vmem:[%s1637_s9] sm:$0xff] }
 0x4c4   : > { %v770_v23 = vpop.f32.mrf.mxu1 }
 0x4c5   : > { %v787_v24 = vpop.permute.xlu2 %786  ;;  %v774_v25 = vsel %vm521_vm5, %v770_v23, -inf }
 0x4c6   : > { %v792_v26 = vsel %vm558_vm6, %v787_v24, 0  ;;  %775 = vmax.xlane.f32.xlu0 %v774_v25 }
 0x4c7   : > { %801 = vmatpush.bf16.msrb.mxu3 %v792_v26 }
 0x4c8   : > { %v1239_v27 = vpop.eup %1238 }
 0x4c9   : > { %v702_v29 = vsel %vm521_vm5, %v1239_v27, 0.0 }
 0x4cc   : > { %v772_v28 = vpop.f32.mrf.mxu1 }
 0x4ce   : > { %703 = vadd.xlane.f32.xlu0 %v702_v29 }
 0x4d3   : > { %612 = vrot.lane.b32.xlu1 %v1479_v37, %s1328_s22  ;;  %s431_s22 = scalar_lea.vmem [#allocation2], %s1088_s1  ;;  %s1274_s1 = scalar_lea.hbm %s1641_s13, 16 }
 0x4d4   : > { %p1276_p1 = scmp.lt.s32.totalorder %s1274_s1, %s1270_s30 }
 0x4d6   : > { %p1277_p2 = por %p1276_p1, %p1275_p0 }
 0x4d8   : > { %p1278_p3 = pnand %p1277_p2, %p1273_p13 }
 0x4e2   : > { %708 = vrot.lane.b32.xlu0 %v1479_v37, %s1329_s23  ;;  %s1022_s23 = sshll.u32 %s431_s22, 4  ;;  %s1023_s23 = int_to_ptr.vmem [resolvable:$true] %s1022_s23 }
 0x52d   : > { %v608_v30 = vpop.xlane.xlu1 %607 }
 0x52e   : > { %1240 = vrcp.f32 %v608_v30 }
 0x534   : > { %v1241_v34 = vpop.eup %1240 }
 0x535   : > { %v610_v36 = vmul.f32 %v1241_v34, %v1237_v17 }
 0x537   : > { %v611_v42 = vpack.c.bf16 %v610_v36, %v610_v36 }
 0x539   : > { %v776_v31 = vpop.xlane.xlu0 %775 }
 0x53a   : > { %v777_v32 = vsub.f32 %v770_v23, %v776_v31 }
 0x53c   : > { %v778_v33 = vmul.f32 1.442695, %v777_v32  ;;  %v1224_v32 = vld [vmem:[%s1635_s7] ss:$0 sm:$0xff] }
 0x53e   : > { %1242 = vpow2.f32 %v778_v33 }
 0x541   : > { %v704_v41 = vpop.xlane.xlu0 %703 }
 0x542   : > { %1244 = vrcp.f32 %v704_v41  ;;  %v1166_v41 = vld [vmem:[%s1639_s11 + $0x28] sm:$0xff] }
 0x544   : > { %v1243_v35 = vpop.eup %1242 }
 0x545   : > { %v613_v38 = vpop.permute.xlu1 %612  ;;  %v780_v39 = vsel %vm521_vm5, %v1243_v35, 0.0 }
 0x546   : > { %781 = vadd.xlane.f32.xlu1 %v780_v39  ;;  %v618_v40 = vsel %vm558_vm6, %v613_v38, 0  ;;  %v1168_v39 = vld [vmem:[%s1639_s11 + $0x38] sm:$0xff] }
 0x547   : > { %627 = vmatpush.bf16.msrb.mxu2 %v618_v40  ;;  %994 = vmatpush.bf16.msra.mxu1 %v1168_v39  ;;  %v1167_v40 = vld [vmem:[%s1639_s11 + $0x30] sm:$0xff] }
 0x548   : > { %v1245_v37 = vpop.eup %1244 }
 0x549   : > { %v706_v43 = vmul.f32 %v1245_v37, %v1239_v27  ;;  %v1164_v37 = vld [vmem:[%s1639_s11 + $0x18] sm:$0xff] }
 0x54a   : > { %1102 = vmatmul.msk.bf16.vlgmr.msrb.gmra.mxu2 %vm521_vm5, %v611_v42  ;;  %v1165_v42 = vld [vmem:[%s1639_s11 + $0x20] sm:$0xff] }
 0x54b   : > { %v707_v46 = vpack.c.bf16 %v706_v43, %v706_v43  ;;  %995 = vmatpush.bf16.msra.mxu1 %v1167_v40  ;;  %v1163_v43 = vld [vmem:[%s1639_s11 + $0x10] sm:$0xff] }
 0x54f   : > { %996 = vmatpush.bf16.msra.mxu1 %v1166_v41 }
 0x553   : > { %997 = vmatpush.bf16.msra.mxu1 %v1165_v42 }
 0x554   : > { %v709_v44 = vpop.permute.xlu0 %708 }
 0x555   : > { %v714_v45 = vsel %vm558_vm6, %v709_v44, 0  ;;  %v1162_v44 = vld [vmem:[%s1639_s11 + $0x8] sm:$0xff] }
 0x556   : > { %723 = vmatpush.bf16.msra.mxu2 %v714_v45  ;;  %v1226_v45 = vld [vmem:[%s1638_s10] ss:$0 sm:$0xff] }
 0x557   : > { %998 = vmatpush.bf16.msra.mxu1 %v1164_v37 }
 0x55a   : > { %1106 = vmatmul.msk.bf16.vlgmr.msra.gmra.mxu2 %vm521_vm5, %v707_v46 }
 0x55b   : > { %822 = vmatpush.bf16.msrb.mxu2 %v813_v56  ;;  %999 = vmatpush.bf16.msra.mxu1 %v1163_v43 }
 0x55f   : > { %1000 = vmatpush.bf16.msra.mxu1 %v1162_v44 }
 0x563   : > { %1001 = vmatpush.bf16.msra.mxu1 %v1161_v47 }
 0x5b9   : > { %v782_v49 = vpop.xlane.xlu1 %781 }
 0x5ba   : > { %1246 = vrcp.f32 %v782_v49 }
 0x5c0   : > { %v1247_v52 = vpop.eup %1246 }
 0x5c1   : > { %v784_v53 = vmul.f32 %v1247_v52, %v1243_v35 }
 0x5c3   : > { %v785_v54 = vpack.c.bf16 %v784_v53, %v784_v53 }
 0x5c5   : > { %1109 = vmatmul.msk.bf16.vlgmr.msrb.gmra.mxu3 %vm521_vm5, %v785_v54 }
 0x5cd   : > { %v629_v57 = vpop.f32.mrf.mxu2 }
 0x5ce   : > { %v633_v58 = vpack.c.bf16 %v629_v57, %v629_v57 }
 0x5d0   : > { %1103 = vmatmul.msk.bf16.vlgmr.msrb.gmra.mxu0 %vm521_vm5, %v633_v58 }
 0x5d5   : > { %v631_v59 = vpop.f32.mrf.mxu2 }
 0x5dd   : > { %v725_v60 = vpop.f32.mrf.mxu2 }
 0x5de   : > { %v729_v61 = vpack.c.bf16 %v725_v60, %v725_v60 }
 0x5e0   : > { %1107 = vmatmul.msk.bf16.vlgmr.msra.gmra.mxu0 %vm521_vm5, %v729_v61 }
 0x5e5   : > { %v727_v62 = vpop.f32.mrf.mxu2 }
 0x648   : > { %v803_v63 = vpop.f32.mrf.mxu3 }
 0x649   : > { %v807_v1 = vpack.c.bf16 %v803_v63, %v803_v63 }
 0x64b   : > { %1110 = vmatmul.msk.bf16.vlgmr.msrb.gmra.mxu2 %vm521_vm5, %v807_v1 }
 0x64d   : > { %v650_v2 = vpop.f32.mrf.mxu0 }
 0x64e   : > { %v670_v5 = vadd.f32 %v1509_v16, %v650_v2 }
 0x650   : > { %v805_v3 = vpop.f32.mrf.mxu3 }
 0x651   : > { %v1227_v3 = vld [vmem:[%s1640_s12] ss:$0 sm:$0xff] }
 0x655   : > { %v652_v4 = vpop.f32.mrf.mxu0 }
 0x65d   : > { %v746_v6 = vpop.f32.mrf.mxu0 }
 0x65e   : > { %v750_v7 = vadd.f32 %v746_v6, %v670_v5 }
 0x665   : > { %v748_v9 = vpop.f32.mrf.mxu0 }
 0x6ce   : > { %v824_v10 = vpop.f32.mrf.mxu2 }
 0x6cf   : > { %v828_v11 = vadd.f32 %v824_v10, %v750_v7 }
 0x6d1   : > { %v829_v13 = vadd.f32 %v828_v11, %v1453_v0  ;;  %v1160_v0 = vld [vmem:[%s1637_s9 + $0x8] sm:$0xff] }
 0x6d2   : > { %897 = vmatpush.bf16.msrb.mxu0 %v1160_v0 }
 0x6d3   : > { %v1543_v14 = vadd.f32 %v1223_v12, %v829_v13 }
 0x6d5   : > { %v835_v15 = vsel %vm438_vm0, %v1543_v14, 0.0 }
 0x6d6   : > { %836 = vadd.xlane.f32.xlu2 %v835_v15  ;;  %v826_v17 = vpop.f32.mrf.mxu2  ;;  %898 = vmatpush.bf16.msrb.mxu0 %v1159_v22 }
 0x749   : > { %v837_v18 = vpop.xlane.xlu2 %836 }
 0x74a   : > { %v838_v16 = vmul.f32 %v837_v18, %v1457_v8 }
 0x74c   : > { %v839_v19 = vsub.f32 %v1543_v14, %v838_v16 }
 0x74e   : > { %v840_v20 = vmul.f32 %v839_v19, %v839_v19 }
 0x750   : > { %v841_v21 = vsel %vm438_vm0, %v840_v20, 0.0 }
 0x751   : > { %842 = vadd.xlane.f32.xlu0 %v841_v21 }
 0x7c4   : > { %v843_v23 = vpop.xlane.xlu0 %842 }
 0x7c5   : > { %v844_v24 = vmul.f32 %v843_v23, %v1457_v8  ;;  %v1225_v8 = vld [vmem:[%s1636_s8] ss:$0 sm:$0xff] }
 0x7c7   : > { %v845_v25 = vadd.f32 1e-05, %v844_v24 }
 0x7c9   : > { %1248 = vrsqrt.f32 %v845_v25  ;;  %vm852_vm8 = vweird.f32 %v845_v25 }
 0x7cf   : > { %v1249_v26 = vpop.eup %1248 }
 0x7d0   : > { %v847_v27 = vmul.f32 %v1249_v26, %v845_v25  ;;  %vm853_vm7 = vweird.f32 %v1249_v26 }
 0x7d1   : > { %vm854_vm9 = vmor %vm852_vm8, %vm853_vm7 }
 0x7d2   : > { %v848_v28 = vmul.f32 %v1249_v26, %v847_v27 }
 0x7d4   : > { %v849_v29 = vmul.f32 0.5, %v848_v28 }
 0x7d6   : > { %v850_v30 = vsub.f32 1.5, %v849_v29 }
 0x7d8   : > { %v851_v31 = vmul.f32 %v1249_v26, %v850_v30 }
 0x7da   : > { %v855_v33 = vsel %vm854_vm9, %v1249_v26, %v851_v31 }
 0x7db   : > { %v856_v34 = vmul.f32 %v855_v33, %v839_v19 }
 0x7dd   : > { %v861_v35 = vmul.f32 %v1224_v32, %v856_v34 }
 0x7df   : > { %v866_v36 = vadd.f32 %v1225_v8, %v861_v35 }
 0x7e1   : > { %v867_v38 = vpack.c.bf16 %v866_v36, %v866_v36 }
 0x7e3   : > { %1119 = vmatmul.msk.bf16.vlgmr.msrb.gmra.mxu0 %vm438_vm0, %v867_v38 }
 0x860   : > { %v900_v46 = vpop.f32.mrf.mxu0 }
 0x861   : > { %v901_v48 = vadd.f32 %v1226_v45, %v900_v46 }
 0x863   : > { %v1120_v49 = vmul.f32 -1.702, %v901_v48 }
 0x865   : > { %v906_v50 = vmul.f32 1.442695, %v1120_v49 }
 0x867   : > { %1250 = vpow2.f32 %v906_v50 }
 0x868   : > { %v902_v51 = vpop.f32.mrf.mxu0 }
 0x86d   : > { %v1251_v52 = vpop.eup %1250 }
 0x86e   : > { %v908_v53 = vadd.f32 1.0, %v1251_v52 }
 0x870   : > { %1252 = vrcp.f32 %v908_v53  ;;  %v920_v57 = vand.u32 2147483648, %v908_v53  ;;  %v918_v59 = vand.u32 2147483647, %v908_v53  ;;  %vm914_vm11 = vweird.f32 %v908_v53 }
 0x872   : > { %v921_v61 = vor.u32 1.1754944e-38, %v920_v57  ;;  %vm919_vm13 = vcmp.eq.f32.partialorder %v918_v59, 8.507059e+37 }
 0x876   : > { %v1253_v54 = vpop.eup %1252 }
 0x877   : > { %v910_v55 = vmul.f32 %v1253_v54, %v908_v53  ;;  %vm915_vm10 = vweird.f32 %v1253_v54 }
 0x878   : > { %vm916_vm12 = vmor %vm914_vm11, %vm915_vm10 }
 0x879   : > { %v911_v56 = vsub.f32 1.0, %v910_v55 }
 0x87b   : > { %v912_v58 = vmul.f32 %v1253_v54, %v911_v56 }
 0x87d   : > { %v913_v60 = vadd.f32 %v1253_v54, %v912_v58 }
 0x87f   : > { %v917_v62 = vsel %vm916_vm12, %v1253_v54, %v913_v60 }
 0x880   : > { %v922_v63 = vsel %vm919_vm13, %v921_v61, %v917_v62 }
 0x881   : > { %v924_v1 = vmul.f32 %v922_v63, %v901_v48 }
 0x883   : > { %v925_v2 = vpack.c.bf16 %v924_v1, %v924_v1 }
 0x885   : > { %1002 = vmatmul.bf16.vlgmr.msra.gmra.mxu1 %v925_v2 }
 0x902   : > { %v1003_v4 = vpop.f32.mrf.mxu1 }
 0x903   : > { %v1004_v5 = vadd.f32 %v1227_v3, %v1003_v4 }
 0x905   : > { %v1007_v6 = vadd.f32 %v1004_v5, %v1543_v14 }
 0x907   : > { %1008 = vst.msk [vmem:[%s431_s22] sm:$0xff] %vm438_vm0, %v1007_v6 }
 0x908   : > { %1281 = shalt.err (!%p1278_p3)
}
 0x909   : > { %1169 = dma.vmem_to_hbm [thread:$0]  (%p1438_p5), %s1023_s23, 128, %s1025_s2, %s1010_s29  }
 0x90a   : > { %v1005_v7 = vpop.f32.mrf.mxu1 }
 0x90b PF: > { %p1175_p4 = scmp.ge.s32.totalorder %s1316_s28, 2  ;;  %s1036_s0 = sand.u32 1, %s1304_s25  }
 0x90c   : > { %s1037_s21 = scalar_lea.sflag [#allocation3], %s1036_s0 }
 0x90d   : > { %p1172_p7 = pnand %p1175_p4, %p1442_p6 }
 0x90f   : > { %p1173_p8 = pneg %p1172_p7 }
 0x911   : > { %1299 = dma.done.wait (%p1173_p8), %s1037_s21, 128  }
 0x912   : > { %1301 = vsyncadd (%p1173_p8), %s1037_s21, 4294967168  ;;  %p23_p9 = scmp.ge.s32.totalorder %s1425_s14, 4   ;;  %s1652_s25 = smov %s1308_s26 }
 0x913   : > { %s1653_s26 = smov %s1312_s27  ;;  %s1654_s27 = smov %s1436_s17 }
 0x914   : > { %s1655_s28 = smov %s1425_s14  ;;  %25 = sbr.rel (!%p23_p9) target bundleno = 8 (0x8), region = 107 }
 0x919   :  { %1043 = vsyncpa [#allocation3], 1 }
 0x91a   :  { %1045 = vsyncpa [#allocation3 + $0x1], 1 }

</bundles_post_ra>
